<compile_context>
chip_gen: v5e
topology: v5e:2x2
jax: 0.10.0
libtpu: 0.0.40
codegen_flags: <defaults>
</compile_context>

<pallas_src>
import jax
import jax.numpy as jnp
from jax import lax
from jax.experimental import pallas as pl
from jax.experimental.pallas import tpu as pltpu

NEG_SLOPE = 0.01  # nn.LeakyReLU default

_TARGET_STEP_BYTES = 12 << 20   # per-grid-step HBM bytes target (hide step overhead)
_VMEM_BLOCK_BUDGET = 40 << 20   # budget for double-buffered blocks (two-pass tiles)
_FUSED_VMEM_BUDGET = 40 << 20   # budget for the fused single-pass path
_VMEM_LIMIT_BYTES = 48 << 20    # scoped VMEM limit (safe on v7x 64 MiB physical)


def _pick_tile(S, height, C, dtype_bytes, tile_s):
    """Spatial tile: multiple of 128 (or full S), sized by HBM-step / VMEM budgets."""
    if S <= 128:
        return S
    if tile_s is None:
        per_lane = (height + 1) * C * dtype_bytes          # pass-2 HBM bytes per lane
        t = min(_TARGET_STEP_BYTES // per_lane,
                _VMEM_BLOCK_BUDGET // (2 * per_lane))      # double-buffered blocks
    else:
        t = int(tile_s)
    if t >= S:
        return S
    return max(128, (t // 128) * 128)


def _mlp_softmax(pooled, w1_ref, w2_ref, height, C):
    """pooled: (C, 1) f32 mean -> list of `height` (C, 1) f32 softmax weights."""
    w1 = w1_ref[...].astype(jnp.float32)                               # (d, C)
    hidden = jnp.dot(w1, pooled, preferred_element_type=jnp.float32)   # (d, 1)
    hidden = jnp.where(hidden >= 0, hidden, NEG_SLOPE * hidden)        # LeakyReLU
    w2 = w2_ref[...].astype(jnp.float32)                               # (height*C, d)
    logits = jnp.dot(w2, hidden, preferred_element_type=jnp.float32)   # (height*C, 1)

    # softmax over the height axis (static sublane slices, h*C offsets)
    per_h = [logits[h * C:(h + 1) * C, :] for h in range(height)]
    m = per_h[0]
    for h in range(1, height):
        m = jnp.maximum(m, per_h[h])
    exps = [jnp.exp(p - m) for p in per_h]
    denom = exps[0]
    for h in range(1, height):
        denom = denom + exps[h]
    inv = pl.reciprocal(denom, approx=False)   # exact; runs once per batch
    return [e * inv for e in exps]             # height x (C, 1)


def _make_fused_kernel(height, C, inv_S, math_dtype):
    """Single pass per batch: pool -> MLP -> softmax -> weighted sum (3N traffic)."""

    def kernel(*refs):
        x_refs = refs[:height]                 # each (C, S), native dtype
        w1_ref = refs[height]                  # (d, C)        torch layout
        w2_ref = refs[height + 1]              # (height*C, d) torch layout
        o_ref = refs[height + 2]               # (C, S), native dtype

        # Global average pool of the summed features (f32); per-height lane
        # reductions avoid materializing an f32 (C, S) temporary in VMEM.
        pooled = jnp.sum(x_refs[0][...].astype(jnp.float32), axis=-1, keepdims=True)
        for h in range(1, height):
            pooled = pooled + jnp.sum(x_refs[h][...].astype(jnp.float32),
                                      axis=-1, keepdims=True)
        pooled = pooled * inv_S                                        # (C, 1) mean

        attn = _mlp_softmax(pooled, w1_ref, w2_ref, height, C)         # h x (C, 1)

        acc = x_refs[0][...].astype(math_dtype) * attn[0].astype(math_dtype)
        for h in range(1, height):
            acc = acc + x_refs[h][...].astype(math_dtype) * attn[h].astype(math_dtype)
        o_ref[...] = acc.astype(o_ref.dtype)

    return kernel


def _make_attn_kernel(height, C, S, TILE_S, inv_S):
    """Pass 1 (fallback): global average pool (grid reduction over S) + MLP + softmax."""
    ragged = (S % TILE_S) != 0

    def kernel(*refs):
        x_refs = refs[:height]                 # each (C, TILE_S), native dtype
        w1_ref = refs[height]                  # (d, C)
        w2_ref = refs[height + 1]              # (height*C, d)
        attn_ref = refs[height + 2]            # (C, height)   f32 output
        acc_ref = refs[height + 3]             # (C, 1)        f32 VMEM scratch

        s_idx = pl.program_id(1)

        # Sum heights elementwise first, then a single cross-lane reduce per tile.
        fsum = x_refs[0][...].astype(jnp.float32)
        for h in range(1, height):
            fsum = fsum + x_refs[h][...].astype(jnp.float32)
        if ragged:
            lane = lax.broadcasted_iota(jnp.int32, (C, TILE_S), 1)
            valid = S - s_idx * TILE_S         # >= TILE_S on all but the last tile
            fsum = jnp.where(lane < valid, fsum, 0.0)
        partial = jnp.sum(fsum, axis=-1, keepdims=True)                # (C, 1)

        @pl.when(s_idx == 0)
        def _():
            acc_ref[...] = partial

        @pl.when(s_idx > 0)
        def _():
            acc_ref[...] = acc_ref[...] + partial

        @pl.when(s_idx == pl.num_programs(1) - 1)
        def _():
            pooled = acc_ref[...] * inv_S                              # (C, 1) mean
            attn = _mlp_softmax(pooled, w1_ref, w2_ref, height, C)
            attn_ref[...] = jnp.concatenate(attn, axis=1).astype(attn_ref.dtype)

    return kernel


def _make_fuse_kernel(height, math_dtype):
    """Pass 2 (fallback): out = sum_h x_h * attn[:, h], streamed per spatial tile."""

    def kernel(*refs):
        attn_ref = refs[0]                     # (C, height) f32
        x_refs = refs[1:1 + height]            # each (C, TILE_S), native dtype
        o_ref = refs[1 + height]               # (C, TILE_S), native dtype

        a = attn_ref[...].astype(math_dtype)   # (C, height), cast once per block
        acc = x_refs[0][...].astype(math_dtype) * a[:, 0:1]
        for h in range(1, height):
            acc = acc + x_refs[h][...].astype(math_dtype) * a[:, h:h + 1]
        o_ref[...] = acc.astype(o_ref.dtype)

    return kernel


def sk_fusion(in_feats, w1, w2, *, tile_s=None, force_two_pass=False):
    """SKFusion forward.

    in_feats: list of `height` arrays (B, C, D, H, W), any float dtype.
    w1: (d, C)          -- Conv3d(dim, d, 1, bias=False) weight squeezed.
    w2: (height*C, d)   -- Conv3d(d, dim*height, 1, bias=False) weight squeezed.
    """
    height = len(in_feats)
    B, C, D, H, W = in_feats[0].shape
    S = D * H * W
    d = w1.shape[0]
    dtype = in_feats[0].dtype
    db = jnp.dtype(dtype).itemsize
    # bf16 math for the weighted sum when inputs are bf16 (v6e/v7x); f32 otherwise.
    math_dtype = (jnp.bfloat16 if jnp.dtype(dtype) == jnp.dtype(jnp.bfloat16)
                  else jnp.float32)

    # Pure views: no HBM-level stack/copy of the feature maps.
    xs = [f.reshape(B, C, S) for f in in_feats]

    # ---- fused single pass (3N traffic) when the per-batch slab fits VMEM ----
    fused_est = (2 * (height + 1) * C * S * db        # double-buffered in/out blocks
                 + (height + 1) * C * S * 4)          # in-body temporaries headroom
    if (not force_two_pass) and fused_est <= _FUSED_VMEM_BUDGET:
        out = pl.pallas_call(
            _make_fused_kernel(height, C, 1.0 / S, math_dtype),
            out_shape=jax.ShapeDtypeStruct((B, C, S), dtype),
            grid_spec=pltpu.PrefetchScalarGridSpec(
                num_scalar_prefetch=0,
                grid=(B,),
                in_specs=(
                    [pl.BlockSpec((None, C, S), lambda b: (b, 0, 0))
                     for _ in range(height)]
                    + [pl.BlockSpec((d, C), lambda b: (0, 0)),
                       pl.BlockSpec((height * C, d), lambda b: (0, 0))]),
                out_specs=pl.BlockSpec((None, C, S), lambda b: (b, 0, 0)),
            ),
            compiler_params=pltpu.CompilerParams(
                dimension_semantics=("parallel",),
                vmem_limit_bytes=_VMEM_LIMIT_BYTES,
            ),
        )(*xs, w1, w2)
        return out.reshape(B, C, D, H, W)

    # ---- two-pass fallback: large byte-budgeted tiles, ragged last tile ------
    TILE_S = _pick_tile(S, height, C, db, tile_s)
    n_s = pl.cdiv(S, TILE_S)

    # pass 1: pooled mean -> MLP -> softmax -> attn (B, C, height) f32
    attn = pl.pallas_call(
        _make_attn_kernel(height, C, S, TILE_S, 1.0 / S),
        out_shape=jax.ShapeDtypeStruct((B, C, height), jnp.float32),
        grid_spec=pltpu.PrefetchScalarGridSpec(
            num_scalar_prefetch=0,
            grid=(B, n_s),
            in_specs=(
                [pl.BlockSpec((None, C, TILE_S), lambda b, s: (b, 0, s))
                 for _ in range(height)]
                + [pl.BlockSpec((d, C), lambda b, s: (0, 0)),
                   pl.BlockSpec((height * C, d), lambda b, s: (0, 0))]),
            out_specs=pl.BlockSpec((None, C, height), lambda b, s: (b, 0, 0)),
            scratch_shapes=[pltpu.VMEM((C, 1), jnp.float32)],
        ),
        compiler_params=pltpu.CompilerParams(
            dimension_semantics=("parallel", "arbitrary"),
            vmem_limit_bytes=_VMEM_LIMIT_BYTES,
        ),
    )(*xs, w1, w2)

    # pass 2: weighted sum over height, native dtype in/out
    out = pl.pallas_call(
        _make_fuse_kernel(height, math_dtype),
        out_shape=jax.ShapeDtypeStruct((B, C, S), dtype),
        grid_spec=pltpu.PrefetchScalarGridSpec(
            num_scalar_prefetch=0,
            grid=(B, n_s),
            in_specs=(
                [pl.BlockSpec((None, C, height), lambda b, s: (b, 0, 0))]
                + [pl.BlockSpec((None, C, TILE_S), lambda b, s: (b, 0, s))
                   for _ in range(height)]),
            out_specs=pl.BlockSpec((None, C, TILE_S), lambda b, s: (b, 0, s)),
        ),
        compiler_params=pltpu.CompilerParams(
            dimension_semantics=("parallel", "parallel"),
            vmem_limit_bytes=_VMEM_LIMIT_BYTES,
        ),
    )(attn, *xs)

    return out.reshape(B, C, D, H, W)


def sk_fusion_ref(in_feats, w1, w2):
    """Pure-JAX reference mirroring the PyTorch forward (computed in f32)."""
    x = jnp.stack([f.astype(jnp.float32) for f in in_feats], axis=1)  # (B,h,C,D,H,W)
    feats_sum = jnp.sum(x, axis=1)
    pooled = jnp.mean(feats_sum, axis=(2, 3, 4))                      # (B, C)
    hidden = pooled @ w1.astype(jnp.float32).T                        # (B, d)
    hidden = jnp.where(hidden >= 0, hidden, NEG_SLOPE * hidden)
    attn = hidden @ w2.astype(jnp.float32).T                          # (B, h*C)
    B = x.shape[0]
    height = len(in_feats)
    C = in_feats[0].shape[1]
    attn = jax.nn.softmax(attn.reshape(B, height, C), axis=1)
    attn = attn[:, :, :, None, None, None]
    return jnp.sum(x * attn, axis=1)


if __name__ == "__main__":
    # Module config: dim = C = 16, height = 2, reduction = 4 -> d = max(16//4, 8) = 8
    B, C, D, H, W = 2, 16, 8, 8, 8
    height = 2
    d = max(C // 4, 8)

    key = jax.random.PRNGKey(0)
    k0, k1, kw1, kw2 = jax.random.split(key, 4)

    feat0 = jax.random.normal(k0, (B, C, D, H, W), dtype=jnp.float32)
    feat1 = jax.random.normal(k1, (B, C, D, H, W), dtype=jnp.float32)

    # Conv3d(dim, d, 1, bias=False)        -> weight (d, C, 1, 1, 1)        -> (d, C)
    # Conv3d(d, dim*height, 1, bias=False) -> weight (C*height, d, 1, 1, 1) -> (C*height, d)
    w1 = 0.1 * jax.random.normal(kw1, (d, C), dtype=jnp.float32)
    w2 = 0.1 * jax.random.normal(kw2, (C * height, d), dtype=jnp.float32)

    ref = sk_fusion_ref([feat0, feat1], w1, w2)

    # 1) fused single-pass path (default), f32.
    out = jax.block_until_ready(sk_fusion([feat0, feat1], w1, w2))
    assert out.shape == (B, C, D, H, W)
    assert out.dtype == jnp.float32
    assert jnp.allclose(out, ref, rtol=1e-2, atol=1e-2), "fused f32 mismatch vs reference"

    # 2) two-pass fallback with a ragged spatial tile (S=512, TILE_S=384 -> cdiv grid
    #    + masked pooling on the last tile).
    out2 = jax.block_until_ready(
        sk_fusion([feat0, feat1], w1, w2, tile_s=384, force_two_pass=True))
    assert jnp.allclose(out2, ref, rtol=1e-2, atol=1e-2), "two-pass ragged mismatch"

    # 3) bf16 native-dtype streaming through the fused path (bf16 weighted sum,
    #    f32 pooling/MLP/softmax).
    f0_bf, f1_bf = feat0.astype(jnp.bfloat16), feat1.astype(jnp.bfloat16)
    ref_bf = sk_fusion_ref([f0_bf, f1_bf], w1, w2)
    out_bf = jax.block_until_ready(sk_fusion([f0_bf, f1_bf], w1, w2))
    assert out_bf.dtype == jnp.bfloat16
    assert jnp.allclose(out_bf.astype(jnp.float32), ref_bf, rtol=5e-2, atol=5e-2), \
        "fused bf16 mismatch vs reference"

    # 4) two-pass bf16 with evenly-divided tiles (exercises the grid reduction).
    out_bf2 = jax.block_until_ready(
        sk_fusion([f0_bf, f1_bf], w1, w2, tile_s=128, force_two_pass=True))
    assert jnp.allclose(out_bf2.astype(jnp.float32), ref_bf, rtol=5e-2, atol=5e-2), \
        "two-pass bf16 mismatch vs reference"

    print("KERNEL_OK")
</pallas_src>

<mosaic_0001>
module attributes {stable_mosaic.version = 11 : i64} {
  func.func @kernel(%arg0: i32, %arg1: memref<1x16x512xf32, #tpu.memory_space<vmem>>, %arg2: memref<1x16x512xf32, #tpu.memory_space<vmem>>, %arg3: memref<8x16xf32, #tpu.memory_space<vmem>>, %arg4: memref<32x8xf32, #tpu.memory_space<vmem>>, %arg5: memref<1x16x512xf32, #tpu.memory_space<vmem>>) attributes {dimension_semantics = [#tpu.dimension_semantics<parallel>], iteration_bounds = array<i64: 2>, scalar_prefetch = 0 : i64, scratch_operands = 0 : i64, tpu.core_type = #tpu.core_type<tc>, window_params = [{transform_indices = @transform_0, window_bounds = array<i64: 1, 16, 512>}, {transform_indices = @transform_1, window_bounds = array<i64: 1, 16, 512>}, {pipeline_mode = #tpu.pipeline_mode<synchronous>, transform_indices = @transform_2, window_bounds = array<i64: 8, 16>}, {pipeline_mode = #tpu.pipeline_mode<synchronous>, transform_indices = @transform_3, window_bounds = array<i64: 32, 8>}, {transform_indices = @transform_4, window_bounds = array<i64: 1, 16, 512>}]} {
    %c0 = arith.constant 0 : index
    %c0_0 = arith.constant 0 : index
    %c0_1 = arith.constant 0 : index
    %0 = vector.load %arg1[%c0, %c0_0, %c0_1] : memref<1x16x512xf32, #tpu.memory_space<vmem>>, vector<1x16x512xf32>
    %1 = vector.shape_cast %0 : vector<1x16x512xf32> to vector<16x512xf32>
    %cst = arith.constant dense<0.000000e+00> : vector<16xf32>
    %2 = vector.multi_reduction <add>, %1, %cst [1] : vector<16x512xf32> to vector<16xf32>
    %3 = vector.shape_cast %2 : vector<16xf32> to vector<16x1xf32>
    %c0_2 = arith.constant 0 : index
    %c0_3 = arith.constant 0 : index
    %c0_4 = arith.constant 0 : index
    %4 = vector.load %arg2[%c0_2, %c0_3, %c0_4] : memref<1x16x512xf32, #tpu.memory_space<vmem>>, vector<1x16x512xf32>
    %5 = vector.shape_cast %4 : vector<1x16x512xf32> to vector<16x512xf32>
    %cst_5 = arith.constant dense<0.000000e+00> : vector<16xf32>
    %6 = vector.multi_reduction <add>, %5, %cst_5 [1] : vector<16x512xf32> to vector<16xf32>
    %7 = vector.shape_cast %6 : vector<16xf32> to vector<16x1xf32>
    %8 = arith.addf %3, %7 : vector<16x1xf32>
    %cst_6 = arith.constant 0.001953125 : f32
    %9 = vector.broadcast %cst_6 : f32 to vector<16x1xf32>
    %10 = arith.mulf %8, %9 : vector<16x1xf32>
    %c0_7 = arith.constant 0 : index
    %c0_8 = arith.constant 0 : index
    %11 = vector.load %arg3[%c0_7, %c0_8] : memref<8x16xf32, #tpu.memory_space<vmem>>, vector<8x16xf32>
    %cst_9 = arith.constant dense<0.000000e+00> : vector<8x1xf32>
    %12 = tpu.matmul %11, %10, %cst_9 {dimension_numbers = #tpu.dot_dimension_numbers<[1], [0], [0], [1], [0, 0, 1, 1], [], []>} : vector<8x16xf32>, vector<16x1xf32>, vector<8x1xf32> -> vector<8x1xf32>
    %cst_10 = arith.constant 0.000000e+00 : f32
    %13 = vector.broadcast %cst_10 : f32 to vector<8x1xf32>
    %14 = arith.cmpf oge, %12, %13 : vector<8x1xf32>
    %cst_11 = arith.constant 0.00999999977 : f32
    %15 = vector.broadcast %cst_11 : f32 to vector<8x1xf32>
    %16 = arith.mulf %15, %12 : vector<8x1xf32>
    %17 = arith.select %14, %12, %16 : vector<8x1xi1>, vector<8x1xf32>
    %c0_12 = arith.constant 0 : index
    %c0_13 = arith.constant 0 : index
    %18 = vector.load %arg4[%c0_12, %c0_13] : memref<32x8xf32, #tpu.memory_space<vmem>>, vector<32x8xf32>
    %cst_14 = arith.constant dense<0.000000e+00> : vector<32x1xf32>
    %19 = tpu.matmul %18, %17, %cst_14 {dimension_numbers = #tpu.dot_dimension_numbers<[1], [0], [0], [1], [0, 0, 1, 1], [], []>} : vector<32x8xf32>, vector<8x1xf32>, vector<32x1xf32> -> vector<32x1xf32>
    %20 = vector.extract_strided_slice %19 {offsets = [0, 0], sizes = [16, 1], strides = [1, 1]} : vector<32x1xf32> to vector<16x1xf32>
    %21 = vector.extract_strided_slice %19 {offsets = [16, 0], sizes = [16, 1], strides = [1, 1]} : vector<32x1xf32> to vector<16x1xf32>
    %22 = arith.maximumf %20, %21 : vector<16x1xf32>
    %23 = arith.subf %20, %22 : vector<16x1xf32>
    %24 = math.exp %23 : vector<16x1xf32>
    %25 = arith.subf %21, %22 : vector<16x1xf32>
    %26 = math.exp %25 : vector<16x1xf32>
    %27 = arith.addf %24, %26 : vector<16x1xf32>
    %28 = tpu.reciprocal %27 : vector<16x1xf32> -> vector<16x1xf32>
    %29 = arith.mulf %24, %28 : vector<16x1xf32>
    %30 = arith.mulf %26, %28 : vector<16x1xf32>
    %c0_15 = arith.constant 0 : index
    %c0_16 = arith.constant 0 : index
    %c0_17 = arith.constant 0 : index
    %31 = vector.load %arg1[%c0_15, %c0_16, %c0_17] : memref<1x16x512xf32, #tpu.memory_space<vmem>>, vector<1x16x512xf32>
    %32 = vector.shape_cast %31 : vector<1x16x512xf32> to vector<16x512xf32>
    %33 = vector.broadcast %29 : vector<16x1xf32> to vector<16x512xf32>
    %34 = arith.mulf %32, %33 : vector<16x512xf32>
    %c0_18 = arith.constant 0 : index
    %c0_19 = arith.constant 0 : index
    %c0_20 = arith.constant 0 : index
    %35 = vector.load %arg2[%c0_18, %c0_19, %c0_20] : memref<1x16x512xf32, #tpu.memory_space<vmem>>, vector<1x16x512xf32>
    %36 = vector.shape_cast %35 : vector<1x16x512xf32> to vector<16x512xf32>
    %37 = vector.broadcast %30 : vector<16x1xf32> to vector<16x512xf32>
    %38 = arith.mulf %36, %37 : vector<16x512xf32>
    %39 = arith.addf %34, %38 : vector<16x512xf32>
    %c0_21 = arith.constant 0 : index
    %c0_22 = arith.constant 0 : index
    %c0_23 = arith.constant 0 : index
    %40 = vector.load %arg5[%c0_21, %c0_22, %c0_23] : memref<1x16x512xf32, #tpu.memory_space<vmem>>, vector<1x16x512xf32>
    %41 = vector.shape_cast %40 : vector<1x16x512xf32> to vector<16x512xf32>
    %42 = vector.shape_cast %39 : vector<16x512xf32> to vector<1x16x512xf32>
    tpu.vector_store %arg5[%c0_21, %c0_22, %c0_23], %42 {strides = array<i32>} : memref<1x16x512xf32, #tpu.memory_space<vmem>>, vector<1x16x512xf32>,
    return
  }
  func.func @transform_0(%arg0: i32) -> (i32, i32, i32) {
    %c0_i32 = arith.constant 0 : i32
    %c0_i32_0 = arith.constant 0 : i32
    %c0_i32_1 = arith.constant 0 : i32
    return %arg0, %c0_i32, %c0_i32_0 : i32, i32, i32
  }
  func.func @transform_1(%arg0: i32) -> (i32, i32, i32) {
    %c0_i32 = arith.constant 0 : i32
    %c0_i32_0 = arith.constant 0 : i32
    %c0_i32_1 = arith.constant 0 : i32
    return %arg0, %c0_i32, %c0_i32_0 : i32, i32, i32
  }
  func.func @transform_2(%arg0: i32) -> (i32, i32) {
    %c0_i32 = arith.constant 0 : i32
    %c0_i32_0 = arith.constant 0 : i32
    %c0_i32_1 = arith.constant 0 : i32
    return %c0_i32, %c0_i32_0 : i32, i32
  }
  func.func @transform_3(%arg0: i32) -> (i32, i32) {
    %c0_i32 = arith.constant 0 : i32
    %c0_i32_0 = arith.constant 0 : i32
    %c0_i32_1 = arith.constant 0 : i32
    return %c0_i32, %c0_i32_0 : i32, i32
  }
  func.func @transform_4(%arg0: i32) -> (i32, i32, i32) {
    %c0_i32 = arith.constant 0 : i32
    %c0_i32_0 = arith.constant 0 : i32
    %c0_i32_1 = arith.constant 0 : i32
    return %arg0, %c0_i32, %c0_i32_0 : i32, i32, i32
  }
}

</mosaic_0001>

<bundles_post_ra>
// kernel: tpu_custom_call.1
= control target key start
LH: loop header
LB: loop body
LE: loop exit
PB: predicated region body
PF: predicated region fallthrough
CT: control target
= control target key end

     0   :  { %s1099_s0 = inlined_call_operand.hbm [shape: f32[2,16,512], index: 0, kind: input, shape index: {}]   ;;  %s1100_s1 = inlined_call_operand.hbm [shape: f32[2,16,512], index: 1, kind: input, shape index: {}]   ;;  %s1101_s2 = inlined_call_operand.vmem [shape: f32[8,16], index: 2, kind: input, shape index: {}]   ;;  %s1102_s3 = inlined_call_operand.vmem [shape: f32[32,8], index: 3, kind: input, shape index: {}]   ;;  %s1103_s4 = inlined_call_operand.hbm [shape: f32[2,16,512], index: 4, kind: output, shape index: {}]  }
   0x1   :  { %1104 = sst [smem:[#allocation12_spill]] %s1099_s0 }
   0x2   :  { %9 = vsyncpa [#allocation3], 0 }
   0x3   :  { %11 = vsyncpa [#allocation3 + $0x1], 0 }
   0x4   :  { %12 = vsyncpa [#allocation6], 0 }
   0x5   :  { %14 = vsyncpa [#allocation6 + $0x1], 0 }
   0x6   :  { %15 = vsyncpa [#allocation4], 0 }
   0x7   :  { %17 = vsyncpa [#allocation4 + $0x1], 0  ;;  %s847_s15 = smov 0   ;;  %s849_s16 = smov 0  }
   0x8   :  { %s851_s17 = smov 0   ;;  %s853_s18 = smov 0  }
   0x9 LB: > { %s868_s19 = sadd.s32 4294967295, %s815_s18   ;;  %s586_s20 = sadd.s32 4294967294, %s815_s18   ;;  %s815_s18 = sphi %s853_s18, %s1118_s18   ;;  %s811_s17 = sphi %s851_s17, %s1117_s17   ;;  %s807_s16 = sphi %s849_s16, %s1116_s16   ;;  %s803_s15 = sphi %s847_s15, %s1115_s15  }
   0xa   : > { %s872_s21 = sadd.s32 1, %s815_s18   ;;  %s30_s22 = sadd.s32 1, %s811_s17 }
   0xb   : > { %s27_s23 = ssub.s32 %s815_s18, %s872_s21  ;;  %p37_p0 = scmp.ne.s32.totalorder %s811_s17, %s807_s16 }
   0xc   : > { %p28_p1 = scmp.eq.s32.totalorder %s27_s23, 0  ;;  %p38_p2 = scmp.eq.s32.totalorder %s815_s18, 0 }
   0xd   : > { %p43_p3 = scmp.ne.s32.totalorder %s807_s16, %s803_s15  ;;  %p44_p4 = scmp.eq.s32.totalorder %s868_s19, 0 }
   0xe   : > { %s884_s24 = scalar_select %p28_p1, %s811_s17, %s30_s22  }
   0xf   : > { %p886_p5 = por %p38_p2, %p37_p0  ;;  %p890_p6 = por %p44_p4, %p43_p3 }
  0x10   : > { %1105 = sst [smem:[#allocation11_spill]] %s884_s24  ;;  %p135_p7 = scmp.eq.s32.totalorder %s868_s19, 1 }
  0x11   : > { %p141_p8 = scmp.eq.s32.totalorder %s586_s20, 1  ;;  %p631_p10 = scmp.lt.s32.totalorder %s815_s18, 2 }
  0x12   : > { %p897_p11 = por %p135_p7, %p37_p0  ;;  %s906_s29 = sand.u32 1, %s811_s17  }
  0x13   : > { %p901_p12 = por %p141_p8, %p43_p3  ;;  %s609_s30 = sshll.u32 %s815_s18, 6 }
  0x14   : > { %s589_s5 = sshll.u32 %s906_s29, 6  ;;  %s1110_s0 = sld [smem:[#allocation12_spill]] }
  0x15   : > { %s171_s10 = scalar_lea.vmem [#allocation2], %s589_s5  ;;  %p919_p13 = pnand %p631_p10, %p886_p5 }
  0x16   : > { %s179_s11 = sshll.u32 %s171_s10, 4  ;;  %p595_p0 = scmp.ge.s32.totalorder %s815_s18, 1  ;;  %s180_s11 = int_to_ptr.vmem [resolvable:$true] %s179_s11 }
  0x17   : > { %p209_p1 = scmp.lt.s32.totalorder %s815_s18, 3  ;;  %s168_s13 = scalar_lea.sflag [#allocation3], %s906_s29 }
  0x18   : > { %p689_p3 = pneg %p919_p13 }
  0x1a   : > { %s176_s8 = scalar_lea.hbm %s1110_s0, %s609_s30  ;;  %s692_s25 = scalar_lea.hbm %s1110_s0, 128 }
  0x1b   : > { %s177_s9 = sshll.u32 %s176_s8, 4  ;;  %s178_s9 = int_to_ptr.hbm [resolvable:$true] %s177_s9 }
  0x1c   : > { %s685_s14 = sshra.s32 %s178_s9, 4  ;;  %s686_s14 = int_to_ptr.hbm [resolvable:$true] %s685_s14 }
  0x1d   : > { %s687_s20 = scalar_lea.hbm %s686_s14, 64  ;;  %p693_p5 = scmp.lt.s32.totalorder %s686_s14, %s1110_s0 }
  0x1e   : > { %p688_p2 = scmp.ne.s32.totalorder %s686_s14, %s687_s20  ;;  %p694_p8 = scmp.lt.s32.totalorder %s692_s25, %s687_s20 }
  0x20   : > { %p690_p4 = pnand %p689_p3, %p688_p2  ;;  %p695_p10 = por %p694_p8, %p693_p5 }
  0x22   : > { %p691_p7 = pneg %p690_p4 }
  0x24   : > { %p696_p9 = pnand %p695_p10, %p691_p7 }
  0x26   : > { %699 = shalt.err (!%p696_p9)
}
  0x27   : > { %s817_s8 = smov 512   ;;  %s818_s10 = smov 32  }
  0x28   : > { %623 = dma.hbm_to_vmem [thread:$0]  (!%p919_p13), %s178_s9, 1024, %s180_s11, %s168_s13, %s817_s8, %s817_s8, %s818_s10  }
  0x29   : > { %p943_p2 = pnand %p595_p0, %p209_p1  ;;  %s198_s23 = scalar_lea.hbm %s1100_s1, %s609_s30 }
  0x2a   : > { %s199_s25 = sshll.u32 %s198_s23, 4  ;;  %s193_s6 = scalar_lea.vmem [#allocation5], %s589_s5  ;;  %s200_s25 = int_to_ptr.hbm [resolvable:$true] %s199_s25 }
  0x2b   : > { %s201_s7 = sshll.u32 %s193_s6, 4  ;;  %s190_s0 = scalar_lea.sflag [#allocation6], %s906_s29  ;;  %s202_s7 = int_to_ptr.vmem [resolvable:$true] %s201_s7 }
  0x2c   : > { %s715_s24 = sshra.s32 %s200_s25, 4  ;;  %s722_s14 = scalar_lea.hbm %s1100_s1, 128  ;;  %s716_s24 = int_to_ptr.hbm [resolvable:$true] %s715_s24 }
  0x2d   : > { %s717_s9 = scalar_lea.hbm %s716_s24, 64  ;;  %p723_p4 = scmp.lt.s32.totalorder %s716_s24, %s1100_s1 }
  0x2e   : > { %p718_p9 = scmp.ne.s32.totalorder %s716_s24, %s717_s9  ;;  %p724_p7 = scmp.lt.s32.totalorder %s722_s14, %s717_s9 }
  0x30   : > { %p720_p0 = pnand %p718_p9, %p689_p3  ;;  %p725_p5 = por %p724_p7, %p723_p4 }
  0x32   : > { %p721_p1 = pneg %p720_p0 }
  0x34   : > { %p726_p8 = pnand %p725_p5, %p721_p1 }
  0x36   : > { %729 = shalt.err (!%p726_p8)
}
  0x37   : > { %626 = dma.hbm_to_vmem [thread:$0]  (!%p919_p13), %s200_s25, 1024, %s202_s7, %s190_s0, %s817_s8, %s817_s8, %s818_s10  }
  0x38   : > { %213 = sbr.rel (%p943_p2) target bundleno = 633 (0x279), region = 36  ;;  %s969_s29 = sand.u32 (!%p943_p2), 1, %s807_s16  }
  0x39   : > { %s972_s5 = sshll.u32 (!%p943_p2), %s969_s29, 6  ;;  %s216_s24 = scalar_lea.sflag (!%p943_p2), [#allocation3], %s969_s29 }
  0x3a   : > { %s219_s23 = scalar_lea.vmem (!%p943_p2), [#allocation2], %s972_s5 }
  0x3d   : > { %790 = dma.done.wait (%p890_p6), %s216_s24, 1024  }
  0x3e   : > { %792 = vsyncadd (%p890_p6), %s216_s24, 4294966272  ;;  %s226_s0 = scalar_lea.sflag [#allocation6], %s969_s29  ;;  %s229_s12 = scalar_lea.vmem [#allocation5], %s972_s5 }
  0x3f   : > { %794 = dma.done.wait (%p890_p6), %s226_s0, 1024  }
  0x40   : > { %796 = vsyncadd (%p890_p6), %s226_s0, 4294966272  ;;  %v986_v0 = vld [vmem:[%s219_s23 + $0x20] sm:$0xff]  ;;  %v988_v1 = vld [vmem:[%s219_s23 + $0x28] sm:$0xff]  ;;  %vm301_vm0 = vcmask 130048   ;;  %vm332_vm2 = vcmask 64512   ;;  %v819_v44 = vmov 0  }
  0x41   : > { %v990_v2 = vld [vmem:[%s219_s23 + $0x30] sm:$0xff]  ;;  %v273_v3 = vadd.f32 %v988_v1, %v986_v0  ;;  %v994_v4 = vld [vmem:[%s219_s23] sm:$0xff]  ;;  %v996_v5 = vld [vmem:[%s219_s23 + $0x8] sm:$0xff]  ;;  %672 = vset.pattern.permute.xlu1 %v819_v44  ;;  %671 = vset.pattern.permute.xlu0 %v819_v44  ;;  %s611_s14 = sshll.u32 %s868_s19, 6  ;;  %s259_s30 = scalar_lea.vmem [#allocation7], %s972_s5 }
  0x42   : > { %v998_v6 = vld [vmem:[%s219_s23 + $0x38] sm:$0xff]  ;;  %v1000_v7 = vld [vmem:[%s219_s23 + $0x10] sm:$0xff]  ;;  %v268_v8 = vadd.f32 %v996_v5, %v994_v4  ;;  %v1004_v9 = vld [vmem:[%s229_s12 + $0x20] sm:$0xff]  ;;  %670 = vset.pattern.permute.xlu2 %v819_v44  ;;  %s487_s19 = sshll.u32 %s259_s30, 4  ;;  %s475_s0 = scalar_lea.sflag [#allocation4], %s969_s29  ;;  %s488_s19 = int_to_ptr.vmem [resolvable:$true] %s487_s19 }
  0x43   : > { %v274_v10 = vadd.f32 %v273_v3, %v990_v2  ;;  %v1007_v11 = vld [vmem:[%s219_s23 + $0x18] sm:$0xff]  ;;  %v1009_v12 = vld [vmem:[%s229_s12 + $0x28] sm:$0xff]  ;;  %v1012_v14 = vld [vmem:[%s229_s12 + $0x30] sm:$0xff]  ;;  %s486_s23 = scalar_lea.hbm %s1103_s4, %s611_s14  ;;  %s765_s22 = scalar_lea.hbm %s1103_s4, 128 }
  0x44   : > { %v269_v13 = vadd.f32 %v268_v8, %v1000_v7  ;;  %v291_v15 = vadd.f32 %v1009_v12, %v1004_v9  ;;  %v1016_v16 = vld [vmem:[%s229_s12] sm:$0xff]  ;;  %v1018_v17 = vld [vmem:[%s229_s12 + $0x8] sm:$0xff]  ;;  %v1021_v19 = vld [vmem:[%s229_s12 + $0x10] sm:$0xff]  ;;  %s489_s5 = sshll.u32 %s486_s23, 4  ;;  %s490_s5 = int_to_ptr.hbm [resolvable:$true] %s489_s5 }
  0x45   : > { %v275_v18 = vadd.f32 %v274_v10, %v998_v6  ;;  %v286_v20 = vadd.f32 %v1018_v17, %v1016_v16  ;;  %v1027_v23 = vld [vmem:[%s229_s12 + $0x38] sm:$0xff]  ;;  %v300_v36 = vld [vmem:[%s1101_s2] sm:$0xff]  ;;  %v329_v39 = vld [vmem:[%s1102_s3 + $0x8] sm:$0xff] }
  0x46   : > { %v270_v21 = vadd.f32 %v269_v13, %v1007_v11  ;;  %v292_v22 = vadd.f32 %v291_v15, %v1012_v14  ;;  %v1030_v25 = vld [vmem:[%s229_s12 + $0x18] sm:$0xff]  ;;  %v328_v42 = vld [vmem:[%s1102_s3] sm:$0xff]  ;;  %v330_v43 = vld [vmem:[%s1102_s3 + $0x10] sm:$0xff]  ;;  %s759_s12 = sshra.s32 %s490_s5, 4  ;;  %s760_s12 = int_to_ptr.hbm [resolvable:$true] %s759_s12 }
  0x47   : > { %276 = vadd.xlane.f32.xlu0 %v275_v18  ;;  %v287_v24 = vadd.f32 %v286_v20, %v1021_v19  ;;  %v331_v41 = vld [vmem:[%s1102_s3 + $0x18] sm:$0xff]  ;;  %s761_s26 = scalar_lea.hbm %s760_s12, 64  ;;  %p766_p10 = scmp.lt.s32.totalorder %s760_s12, %s1103_s4 }
  0x48   : > { %271 = vadd.xlane.f32.xlu1 %v270_v21  ;;  %v293_v26 = vadd.f32 %v292_v22, %v1027_v23  ;;  %p762_p6 = scmp.ne.s32.totalorder %s760_s12, %s761_s26  ;;  %p767_p2 = scmp.lt.s32.totalorder %s765_s22, %s761_s26 }
  0x49   : > { %v288_v27 = vadd.f32 %v287_v24, %v1030_v25 }
  0x4a   : > { %p763_p13 = pnand %p762_p6, %p897_p11  ;;  %p768_p9 = por %p767_p2, %p766_p10 }
  0x4c   : > { %p764_p3 = pneg %p763_p13 }
  0x4e   : > { %p769_p0 = pnand %p768_p9, %p764_p3 }
  0x4f   : > { %294 = vadd.xlane.f32.xlu0 %v293_v26 }
  0x50   : > { %289 = vadd.xlane.f32.xlu1 %v288_v27 }
  0xba   : > { %v277_v28 = vpop.xlane.xlu0 %276 }
  0xbb   : > { %v272_v29 = vpop.xlane.xlu1 %271 }
  0xc2   : > { %v295_v30 = vpop.xlane.xlu0 %294 }
  0xc3   : > { %v290_v31 = vpop.xlane.xlu1 %289  ;;  %v297_v32 = vadd.f32 %v295_v30, %v277_v28 }
  0xc4   : > { %v296_v33 = vadd.f32 %v290_v31, %v272_v29 }
  0xc5   : > { %v299_v34 = vmul.f32 0.001953125, %v297_v32 }
  0xc6   : > { %v298_v35 = vmul.f32 0.001953125, %v296_v33 }
  0xc7   : > { %319 = vmatpush.msra.mxu0 %v299_v34 }
  0xc9   : > { %320 = vmatpush.msra.mxu0 %v298_v35 }
  0xca   : > { %599 = vmatmul.msk.f32.vlgmr.msra.gmra.mxu0 %vm301_vm0, %v300_v36 }
 0x147   : > { %v322_v37 = vpop.f32.mrf.mxu0 }
 0x148   : > { %vm325_vm1 = vcmp.ge.f32.partialorder %v322_v37, 0.0  ;;  %v326_v38 = vmul.f32 0.01, %v322_v37 }
 0x14a   : > { %v327_v40 = vsel %vm325_vm1, %v322_v37, %v326_v38 }
 0x14b   : > { %360 = vmatpush.msra.mxu1 %v327_v40  ;;  %612 = vmatpush.msra.mxu2 %v327_v40 }
 0x14c   : > { %613 = vmatpush.msra.mxu3 %v327_v40  ;;  %601 = vmatmul.msk.f32.vlgmr.msra.gmra.mxu2 %vm332_vm2, %v329_v39 }
 0x14d   : > { %603 = vmatmul.msk.f32.vlgmr.msra.gmra.mxu3 %vm332_vm2, %v331_v41  ;;  %600 = vmatmul.msk.f32.vlgmr.msra.gmra.mxu1 %vm332_vm2, %v328_v42 }
 0x154   : > { %602 = vmatmul.msk.f32.gmra.mxu2 %vm332_vm2, %v330_v43 }
 0x1ca   : > { %v362_v52 = vpop.f32.mrf.mxu1 }
 0x1cf   : > { %v365_v45 = vpop.f32.mrf.mxu2 }
 0x1d0   : > { %v371_v46 = vpop.f32.mrf.mxu3 }
 0x1d1   : > { %v375_v47 = vmax.f32 %v365_v45, %v371_v46 }
 0x1d3   : > { %v377_v48 = vsub.f32 %v365_v45, %v375_v47  ;;  %v383_v49 = vsub.f32 %v371_v46, %v375_v47 }
 0x1d5   : > { %v380_v50 = vmul.f32 1.442695, %v377_v48  ;;  %v386_v51 = vmul.f32 1.442695, %v383_v49 }
 0x1d7   : > { %673 = vpow2.f32 %v380_v50  ;;  %v368_v53 = vpop.f32.mrf.mxu2 }
 0x1d8   : > { %675 = vpow2.f32 %v386_v51  ;;  %v374_v54 = vmax.f32 %v362_v52, %v368_v53 }
 0x1da   : > { %v376_v55 = vsub.f32 %v362_v52, %v374_v54  ;;  %v382_v56 = vsub.f32 %v368_v53, %v374_v54 }
 0x1dc   : > { %v378_v57 = vmul.f32 1.442695, %v376_v55  ;;  %v384_v58 = vmul.f32 1.442695, %v382_v56 }
 0x1dd   : > { %v674_v59 = vpop.eup %673 }
 0x1de   : > { %v676_v60 = vpop.eup %675  ;;  %677 = vpow2.f32 %v378_v57 }
 0x1df   : > { %v389_v61 = vadd.f32 %v676_v60, %v674_v59  ;;  %679 = vpow2.f32 %v384_v58 }
 0x1e1   : > { %681 = vrcp.f32 %v389_v61  ;;  %v415_v15 = vand.u32 2147483648, %v389_v61  ;;  %v413_v20 = vand.u32 2147483647, %v389_v61  ;;  %vm409_vm4 = vweird.f32 %v389_v61 }
 0x1e3   : > { %v416_v24 = vor.u32 1.1754944e-38, %v415_v15  ;;  %vm414_vm6 = vcmp.eq.f32.partialorder %v413_v20, 8.507059e+37 }
 0x1e4   : > { %v678_v62 = vpop.eup %677 }
 0x1e5   : > { %v680_v63 = vpop.eup %679 }
 0x1e6   : > { %v388_v3 = vadd.f32 %v680_v63, %v678_v62 }
 0x1e7   : > { %v682_v8 = vpop.eup %681 }
 0x1e8   : > { %683 = vrcp.f32 %v388_v3  ;;  %v405_v10 = vmul.f32 %v682_v8, %v389_v61  ;;  %vm410_vm3 = vweird.f32 %v682_v8  ;;  %v401_v31 = vand.u32 2147483648, %v388_v3 }
 0x1e9   : > { %vm411_vm5 = vmor %vm409_vm4, %vm410_vm3  ;;  %v399_v33 = vand.u32 2147483647, %v388_v3  ;;  %vm395_vm8 = vweird.f32 %v388_v3 }
 0x1ea   : > { %v406_v13 = vsub.f32 1.0, %v405_v10  ;;  %v402_v35 = vor.u32 1.1754944e-38, %v401_v31 }
 0x1eb   : > { %vm400_vm10 = vcmp.eq.f32.partialorder %v399_v33, 8.507059e+37 }
 0x1ec   : > { %v407_v18 = vmul.f32 %v682_v8, %v406_v13 }
 0x1ee   : > { %v684_v21 = vpop.eup %683  ;;  %v408_v22 = vadd.f32 %v682_v8, %v407_v18 }
 0x1ef   : > { %v391_v26 = vmul.f32 %v684_v21, %v388_v3  ;;  %vm396_vm7 = vweird.f32 %v684_v21 }
 0x1f0   : > { %v412_v27 = vsel %vm411_vm5, %v682_v8, %v408_v22  ;;  %vm397_vm9 = vmor %vm395_vm8, %vm396_vm7 }
 0x1f1   : > { %v417_v28 = vsel %vm414_vm6, %v416_v24, %v412_v27  ;;  %v392_v29 = vsub.f32 1.0, %v391_v26 }
 0x1f2   : > { %v421_v30 = vmul.f32 %v676_v60, %v417_v28  ;;  %v419_v40 = vmul.f32 %v674_v59, %v417_v28 }
 0x1f3   : > { %v393_v32 = vmul.f32 %v684_v21, %v392_v29 }
 0x1f4   : > { %447 = vperm.xlu1 %672, %v421_v30  }
 0x1f5   : > { %v394_v34 = vadd.f32 %v684_v21, %v393_v32 }
 0x1f7   : > { %v398_v36 = vsel %vm397_vm9, %v684_v21, %v394_v34 }
 0x1f8   : > { %v403_v37 = vsel %vm400_vm10, %v402_v35, %v398_v36 }
 0x1f9   : > { %v420_v38 = vmul.f32 %v680_v63, %v403_v37  ;;  %v418_v39 = vmul.f32 %v678_v62, %v403_v37 }
 0x1fb   : > { %442 = vperm.xlu0 %671, %v420_v38   ;;  %424 = vperm.xlu2 %670, %v418_v39  }
 0x203   : > { %429 = vperm.xlu2 %670, %v419_v40  }
 0x255   : > { %v425_v41 = vpop.permute.xlu2 %424 }
 0x256   : > { %v435_v56 = vmul.f32 %v425_v41, %v1007_v11 }
 0x25d   : > { %v430_v42 = vpop.permute.xlu2 %429 }
 0x25e   : > { %v436_v43 = vmul.f32 %v430_v42, %v986_v0  ;;  %v437_v44 = vmul.f32 %v430_v42, %v988_v1  ;;  %v438_v45 = vmul.f32 %v430_v42, %v990_v2  ;;  %v439_v51 = vmul.f32 %v430_v42, %v998_v6 }
 0x25f   : > { %v432_v1 = vmul.f32 %v425_v41, %v994_v4  ;;  %v433_v2 = vmul.f32 %v425_v41, %v996_v5 }
 0x266   : > { %v448_v46 = vpop.permute.xlu1 %447 }
 0x267   : > { %v454_v47 = vmul.f32 %v448_v46, %v1004_v9  ;;  %v455_v48 = vmul.f32 %v448_v46, %v1009_v12  ;;  %v456_v49 = vmul.f32 %v448_v46, %v1012_v14  ;;  %v457_v50 = vmul.f32 %v448_v46, %v1027_v23 }
 0x268   : > { %v434_v9 = vmul.f32 %v425_v41, %v1000_v7 }
 0x269   : > { %v462_v52 = vadd.f32 %v454_v47, %v436_v43  ;;  %v463_v53 = vadd.f32 %v455_v48, %v437_v44  ;;  %v464_v54 = vadd.f32 %v456_v49, %v438_v45  ;;  %v465_v0 = vadd.f32 %v457_v50, %v439_v51 }
 0x26b   : > { %470 = vst [vmem:[%s259_s30 + $0x20] sm:$0xff] %v462_v52 }
 0x26c   : > { %471 = vst [vmem:[%s259_s30 + $0x28] sm:$0xff] %v463_v53 }
 0x26d   : > { %472 = vst [vmem:[%s259_s30 + $0x30] sm:$0xff] %v464_v54  ;;  %v443_v6 = vpop.permute.xlu0 %442 }
 0x26e   : > { %473 = vst [vmem:[%s259_s30 + $0x38] sm:$0xff] %v465_v0  ;;  %v450_v12 = vmul.f32 %v443_v6, %v1016_v16  ;;  %v451_v14 = vmul.f32 %v443_v6, %v1018_v17  ;;  %v452_v23 = vmul.f32 %v443_v6, %v1021_v19  ;;  %v453_v55 = vmul.f32 %v443_v6, %v1030_v25 }
 0x270   : > { %v458_v4 = vadd.f32 %v450_v12, %v432_v1  ;;  %v459_v5 = vadd.f32 %v451_v14, %v433_v2  ;;  %v460_v7 = vadd.f32 %v452_v23, %v434_v9  ;;  %v461_v57 = vadd.f32 %v453_v55, %v435_v56 }
 0x272   : > { %466 = vst [vmem:[%s259_s30] sm:$0xff] %v458_v4 }
 0x273   : > { %467 = vst [vmem:[%s259_s30 + $0x8] sm:$0xff] %v459_v5 }
 0x274   : > { %468 = vst [vmem:[%s259_s30 + $0x10] sm:$0xff] %v460_v7 }
 0x275   : > { %469 = vst [vmem:[%s259_s30 + $0x18] sm:$0xff] %v461_v57 }
 0x276   : > { %772 = shalt.err (!%p769_p0)
}
 0x277   : > { %s820_s29 = smov 512   ;;  %s821_s7 = smov 32  }
 0x278   : > { %618 = dma.vmem_to_hbm [thread:$0]  (%p897_p11), %s488_s19, 1024, %s490_s5, %s475_s0, %s820_s29, %s820_s29, %s821_s7  }
 0x279 PF: > { %s504_s9 = sand.u32 1, %s803_s15   ;;  %p1113_p1 = scmp.ge.s32.totalorder %s815_s18, 2 }
 0x27a   : > { %s505_s11 = scalar_lea.sflag [#allocation4], %s504_s9 }
 0x27b   : > { %p628_p4 = pnand %p1113_p1, %p901_p12 }
 0x27d   : > { %p629_p7 = pneg %p628_p4 }
 0x27f   : > { %798 = dma.done.wait (%p629_p7), %s505_s11, 1024  }
 0x280   : > { %800 = vsyncadd (%p629_p7), %s505_s11, 4294966272  ;;  %s1114_s13 = sld [smem:[#allocation11_spill]]  ;;  %p20_p5 = scmp.ge.s32.totalorder %s872_s21, 4  }
 0x281   : > { %s1115_s15 = smov %s807_s16  ;;  %s1116_s16 = smov %s811_s17 }
 0x282   : > { %s1118_s18 = smov %s872_s21  ;;  %22 = sbr.rel (!%p20_p5) target bundleno = 9 (0x9), region = 94 }
 0x286   : > { %s1117_s17 = smov %s1114_s13 }
 0x287   :  { %511 = vsyncpa [#allocation3], 1 }
 0x288   :  { %513 = vsyncpa [#allocation3 + $0x1], 1 }
 0x289   :  { %514 = vsyncpa [#allocation6], 1 }
 0x28a   :  { %516 = vsyncpa [#allocation6 + $0x1], 1 }
 0x28b   :  { %517 = vsyncpa [#allocation4], 1 }
 0x28c   :  { %519 = vsyncpa [#allocation4 + $0x1], 1 }

</bundles_post_ra>
